<compile_context>
chip_gen: v7x
topology: tpu7x:2x2x1
jax: 0.10.0
libtpu: 0.0.40
codegen_flags: <defaults>
</compile_context>

<pallas_src>
import jax
import jax.numpy as jnp
import numpy as np
from jax.experimental import pallas as pl
from jax.experimental.pallas import tpu as pltpu

HIDDEN = 32      # per-encoder and final-encoder output dim, fixed by the module
TB_MAX = 2048    # max batch-tile rows (x tile: TB x d_total f32, ~<=1 MiB in VMEM)


def _round_up(x: int, m: int) -> int:
    return ((x + m - 1) // m) * m


# ---------------------------------------------------------------------------
# Kernel: one grid step processes a (TB, d_total) slab of the batch.
# ---------------------------------------------------------------------------
def _critic_kernel(x_ref, wblk_ref, bblk_ref, wf_ref, bf_ref, wc_ref, bc_ref,
                   out_ref):
    x = x_ref[...]                                          # (TB, d_total)

    # Fused per-observation encoders: tanh(x @ W_blockdiag^T + b) -> (TB, h_cat)
    h1 = jnp.tanh(
        jnp.dot(x, wblk_ref[...], preferred_element_type=jnp.float32)
        + bblk_ref[...]
    )

    # Final encoder: tanh(h1 @ Wf^T + bf) -> (TB, 32)
    h2 = jnp.tanh(
        jnp.dot(h1, wf_ref[...], preferred_element_type=jnp.float32)
        + bf_ref[...]
    )

    # Critic head (32 -> 1): broadcast-mul (VPU) + lane reduce (XLU) instead of
    # an N=1 MXU matmul.  Masked 1-lane output store is negligible.
    out_ref[...] = (
        jnp.sum(h2 * wc_ref[...], axis=-1, keepdims=True) + bc_ref[...]
    )


# ---------------------------------------------------------------------------
# Parameter packing (done once, outside the kernel).
# PyTorch nn.Linear stores W as (out, in); we pre-transpose so the kernel can
# run y = x @ W^T directly in batch-on-sublane layout.
# ---------------------------------------------------------------------------
def pack_params(params, obs_dims):
    d_total = int(sum(obs_dims))
    h_cat = len(obs_dims) * HIDDEN          # 96 for 3 observations; no 128-pad

    w_blk = jnp.zeros((d_total, h_cat), jnp.float32)
    b_blk = jnp.zeros((1, h_cat), jnp.float32)
    off = 0
    for i, (w, b) in enumerate(params["enc"]):        # w: (32, d_i), b: (32,)
        d_i = obs_dims[i]
        w_blk = w_blk.at[off:off + d_i, i * HIDDEN:(i + 1) * HIDDEN].set(w.T)
        b_blk = b_blk.at[0, i * HIDDEN:(i + 1) * HIDDEN].set(b)
        off += d_i

    wf, bf = params["final"]                           # (32, h_cat), (32,)
    wf_t = wf.T                                        # (h_cat, 32)
    bf_row = bf.reshape(1, HIDDEN)

    wc, bc = params["critic"]                          # (1, 32), (1,)
    bc_11 = bc.reshape(1, 1)

    return w_blk, b_blk, wf_t, bf_row, wc, bc_11


# ---------------------------------------------------------------------------
# Batch tiling: pad batch only to a multiple of 8, pick a tile <= TB_MAX, and
# give the 'parallel' grid axis >= 2 steps when possible (v7x megacore).
# ---------------------------------------------------------------------------
def _choose_tiling(B: int):
    b8 = _round_up(max(B, 1), 8)
    n = -(-b8 // TB_MAX)                   # tiles needed at the max tile size
    if n == 1 and b8 >= 16:
        n = 2                              # let v7x shard the batch axis
    tb = _round_up(-(-b8 // n), 8)         # tile rows, multiple of 8
    return tb * n, tb, n                   # (padded batch, tile rows, grid steps)


# ---------------------------------------------------------------------------
# Wrapper
# ---------------------------------------------------------------------------
def critic_forward(observations, params):
    """observations: list of (B, d_i) f32 arrays.  Returns (B, 1) f32 values."""
    obs_dims = [int(o.shape[1]) for o in observations]
    B = int(observations[0].shape[0])
    d_total = int(sum(obs_dims))
    h_cat = len(observations) * HIDDEN

    w_blk, b_blk, wf_t, bf_r, wc, bc = pack_params(params, obs_dims)

    # Concatenate observations; keep batch on the sublane axis (no transpose).
    x = jnp.concatenate(observations, axis=1)          # (B, d_total)
    b_pad, tb, n_tiles = _choose_tiling(B)
    if b_pad > B:
        x = jnp.pad(x, ((0, b_pad - B), (0, 0)))

    flops = 2 * b_pad * (d_total * h_cat + h_cat * HIDDEN + HIDDEN)
    transcendentals = b_pad * (h_cat + HIDDEN)
    bytes_accessed = 4 * (b_pad * d_total + w_blk.size + b_blk.size
                          + wf_t.size + bf_r.size + wc.size + bc.size + b_pad)

    def resident(arr):
        # Full-array block, constant index_map -> stays VMEM-resident.
        return pl.BlockSpec(arr.shape, lambda i: (0, 0))

    out = pl.pallas_call(
        _critic_kernel,
        out_shape=jax.ShapeDtypeStruct((b_pad, 1), jnp.float32),
        grid=(n_tiles,),
        in_specs=[
            pl.BlockSpec((tb, d_total), lambda i: (i, 0)),   # x tile (pipelined)
            resident(w_blk),
            resident(b_blk),
            resident(wf_t),
            resident(bf_r),
            resident(wc),
            resident(bc),
        ],
        out_specs=pl.BlockSpec((tb, 1), lambda i: (i, 0)),
        compiler_params=pltpu.CompilerParams(
            dimension_semantics=("parallel",),
        ),
        cost_estimate=pl.CostEstimate(
            flops=int(flops),
            transcendentals=int(transcendentals),
            bytes_accessed=int(bytes_accessed),
        ),
    )(x, w_blk, b_blk, wf_t, bf_r, wc, bc)

    return out[:B]                                       # (B, 1)


# ---------------------------------------------------------------------------
# Pure-JAX reference (PyTorch semantics: y = x @ W.T + b)
# ---------------------------------------------------------------------------
def critic_forward_ref(observations, params):
    encs = []
    for obs, (w, b) in zip(observations, params["enc"]):
        encs.append(jnp.tanh(obs @ w.T + b))
    cat = jnp.concatenate(encs, axis=-1)
    wf, bf = params["final"]
    hf = jnp.tanh(cat @ wf.T + bf)
    wc, bc = params["critic"]
    return hf @ wc.T + bc


def init_params(key, obs_dims):
    """Deterministic init mirroring nn.Linear's U(-1/sqrt(fan_in), ...).
    Weights are stored in PyTorch (out_features, in_features) layout."""
    params = {"enc": []}
    for d in obs_dims:
        key, kw, kb = jax.random.split(key, 3)
        bound = 1.0 / np.sqrt(d)
        w = jax.random.uniform(kw, (HIDDEN, d), jnp.float32, -bound, bound)
        b = jax.random.uniform(kb, (HIDDEN,), jnp.float32, -bound, bound)
        params["enc"].append((w, b))

    fan_in = len(obs_dims) * HIDDEN
    key, kw, kb = jax.random.split(key, 3)
    bound = 1.0 / np.sqrt(fan_in)
    wf = jax.random.uniform(kw, (HIDDEN, fan_in), jnp.float32, -bound, bound)
    bf = jax.random.uniform(kb, (HIDDEN,), jnp.float32, -bound, bound)
    params["final"] = (wf, bf)

    key, kw, kb = jax.random.split(key, 3)
    bound = 1.0 / np.sqrt(HIDDEN)
    wc = jax.random.uniform(kw, (1, HIDDEN), jnp.float32, -bound, bound)
    bc = jax.random.uniform(kb, (1,), jnp.float32, -bound, bound)
    params["critic"] = (wc, bc)
    return params


if __name__ == "__main__":
    key = jax.random.PRNGKey(0)

    # Small shapes consistent with the module: 3 observation types, batch of 8.
    obs_dims = [16, 8, 12]
    batch = 8

    key, pkey = jax.random.split(key)
    params = init_params(pkey, obs_dims)

    observations = []
    for d in obs_dims:
        key, okey = jax.random.split(key)
        observations.append(jax.random.normal(okey, (batch, d), jnp.float32))

    out = critic_forward(observations, params)
    out = jax.block_until_ready(out)

    ref = critic_forward_ref(observations, params)
    # Tolerance accommodates possible reduced-precision (bf16-pass) f32 matmuls
    # on the MXU vs. XLA's default-precision reference; structural errors would
    # be orders of magnitude larger than this.
    np.testing.assert_allclose(np.asarray(out), np.asarray(ref),
                               rtol=5e-3, atol=5e-3)
    assert out.shape == (batch, 1)

    print("KERNEL_OK")
</pallas_src>

<mosaic_0001>
module attributes {stable_mosaic.version = 11 : i64} {
  func.func @_critic_kernel(%arg0: i32, %arg1: memref<8x36xf32, #tpu.memory_space<vmem>>, %arg2: memref<36x96xf32, #tpu.memory_space<vmem>>, %arg3: memref<1x96xf32, #tpu.memory_space<vmem>>, %arg4: memref<96x32xf32, #tpu.memory_space<vmem>>, %arg5: memref<1x32xf32, #tpu.memory_space<vmem>>, %arg6: memref<1x32xf32, #tpu.memory_space<vmem>>, %arg7: memref<1x1xf32, #tpu.memory_space<vmem>>, %arg8: memref<8x1xf32, #tpu.memory_space<vmem>>) attributes {dimension_semantics = [#tpu.dimension_semantics<parallel>], iteration_bounds = array<i64: 1>, scalar_prefetch = 0 : i64, scratch_operands = 0 : i64, tpu.core_type = #tpu.core_type<tc>, window_params = [{transform_indices = @transform_0, window_bounds = array<i64: 8, 36>}, {pipeline_mode = #tpu.pipeline_mode<synchronous>, transform_indices = @transform_1, window_bounds = array<i64: 36, 96>}, {pipeline_mode = #tpu.pipeline_mode<synchronous>, transform_indices = @transform_2, window_bounds = array<i64: 1, 96>}, {pipeline_mode = #tpu.pipeline_mode<synchronous>, transform_indices = @transform_3, window_bounds = array<i64: 96, 32>}, {pipeline_mode = #tpu.pipeline_mode<synchronous>, transform_indices = @transform_4, window_bounds = array<i64: 1, 32>}, {pipeline_mode = #tpu.pipeline_mode<synchronous>, transform_indices = @transform_5, window_bounds = array<i64: 1, 32>}, {pipeline_mode = #tpu.pipeline_mode<synchronous>, transform_indices = @transform_6, window_bounds = array<i64: 1, 1>}, {transform_indices = @transform_7, window_bounds = array<i64: 8, 1>}]} {
    %c0 = arith.constant 0 : index
    %c0_0 = arith.constant 0 : index
    %0 = vector.load %arg1[%c0, %c0_0] : memref<8x36xf32, #tpu.memory_space<vmem>>, vector<8x36xf32>
    %c0_1 = arith.constant 0 : index
    %c0_2 = arith.constant 0 : index
    %1 = vector.load %arg2[%c0_1, %c0_2] : memref<36x96xf32, #tpu.memory_space<vmem>>, vector<36x96xf32>
    %cst = arith.constant dense<0.000000e+00> : vector<8x96xf32>
    %2 = tpu.matmul %0, %1, %cst {dimension_numbers = #tpu.dot_dimension_numbers<[1], [0], [0], [1], [0, 0, 1, 1], [], []>} : vector<8x36xf32>, vector<36x96xf32>, vector<8x96xf32> -> vector<8x96xf32>
    %c0_3 = arith.constant 0 : index
    %c0_4 = arith.constant 0 : index
    %3 = vector.load %arg3[%c0_3, %c0_4] : memref<1x96xf32, #tpu.memory_space<vmem>>, vector<1x96xf32>
    %4 = vector.broadcast %3 : vector<1x96xf32> to vector<8x96xf32>
    %5 = arith.addf %2, %4 : vector<8x96xf32>
    %6 = math.tanh %5 : vector<8x96xf32>
    %c0_5 = arith.constant 0 : index
    %c0_6 = arith.constant 0 : index
    %7 = vector.load %arg4[%c0_5, %c0_6] : memref<96x32xf32, #tpu.memory_space<vmem>>, vector<96x32xf32>
    %cst_7 = arith.constant dense<0.000000e+00> : vector<8x32xf32>
    %8 = tpu.matmul %6, %7, %cst_7 {dimension_numbers = #tpu.dot_dimension_numbers<[1], [0], [0], [1], [0, 0, 1, 1], [], []>} : vector<8x96xf32>, vector<96x32xf32>, vector<8x32xf32> -> vector<8x32xf32>
    %c0_8 = arith.constant 0 : index
    %c0_9 = arith.constant 0 : index
    %9 = vector.load %arg5[%c0_8, %c0_9] : memref<1x32xf32, #tpu.memory_space<vmem>>, vector<1x32xf32>
    %10 = vector.broadcast %9 : vector<1x32xf32> to vector<8x32xf32>
    %11 = arith.addf %8, %10 : vector<8x32xf32>
    %12 = math.tanh %11 : vector<8x32xf32>
    %c0_10 = arith.constant 0 : index
    %c0_11 = arith.constant 0 : index
    %13 = vector.load %arg6[%c0_10, %c0_11] : memref<1x32xf32, #tpu.memory_space<vmem>>, vector<1x32xf32>
    %14 = vector.broadcast %13 : vector<1x32xf32> to vector<8x32xf32>
    %15 = arith.mulf %12, %14 : vector<8x32xf32>
    %cst_12 = arith.constant dense<0.000000e+00> : vector<8xf32>
    %16 = vector.multi_reduction <add>, %15, %cst_12 [1] : vector<8x32xf32> to vector<8xf32>
    %17 = vector.shape_cast %16 : vector<8xf32> to vector<8x1xf32>
    %c0_13 = arith.constant 0 : index
    %c0_14 = arith.constant 0 : index
    %18 = vector.load %arg7[%c0_13, %c0_14] : memref<1x1xf32, #tpu.memory_space<vmem>>, vector<1x1xf32>
    %19 = vector.broadcast %18 : vector<1x1xf32> to vector<8x1xf32>
    %20 = arith.addf %17, %19 : vector<8x1xf32>
    %c0_15 = arith.constant 0 : index
    %c0_16 = arith.constant 0 : index
    %21 = vector.load %arg8[%c0_15, %c0_16] : memref<8x1xf32, #tpu.memory_space<vmem>>, vector<8x1xf32>
    tpu.vector_store %arg8[%c0_15, %c0_16], %20 {strides = array<i32>} : memref<8x1xf32, #tpu.memory_space<vmem>>, vector<8x1xf32>,
    return
  }
  func.func @transform_0(%arg0: i32) -> (i32, i32) {
    %c0_i32 = arith.constant 0 : i32
    %c0_i32_0 = arith.constant 0 : i32
    return %arg0, %c0_i32 : i32, i32
  }
  func.func @transform_1(%arg0: i32) -> (i32, i32) {
    %c0_i32 = arith.constant 0 : i32
    %c0_i32_0 = arith.constant 0 : i32
    %c0_i32_1 = arith.constant 0 : i32
    return %c0_i32, %c0_i32_0 : i32, i32
  }
  func.func @transform_2(%arg0: i32) -> (i32, i32) {
    %c0_i32 = arith.constant 0 : i32
    %c0_i32_0 = arith.constant 0 : i32
    %c0_i32_1 = arith.constant 0 : i32
    return %c0_i32, %c0_i32_0 : i32, i32
  }
  func.func @transform_3(%arg0: i32) -> (i32, i32) {
    %c0_i32 = arith.constant 0 : i32
    %c0_i32_0 = arith.constant 0 : i32
    %c0_i32_1 = arith.constant 0 : i32
    return %c0_i32, %c0_i32_0 : i32, i32
  }
  func.func @transform_4(%arg0: i32) -> (i32, i32) {
    %c0_i32 = arith.constant 0 : i32
    %c0_i32_0 = arith.constant 0 : i32
    %c0_i32_1 = arith.constant 0 : i32
    return %c0_i32, %c0_i32_0 : i32, i32
  }
  func.func @transform_5(%arg0: i32) -> (i32, i32) {
    %c0_i32 = arith.constant 0 : i32
    %c0_i32_0 = arith.constant 0 : i32
    %c0_i32_1 = arith.constant 0 : i32
    return %c0_i32, %c0_i32_0 : i32, i32
  }
  func.func @transform_6(%arg0: i32) -> (i32, i32) {
    %c0_i32 = arith.constant 0 : i32
    %c0_i32_0 = arith.constant 0 : i32
    %c0_i32_1 = arith.constant 0 : i32
    return %c0_i32, %c0_i32_0 : i32, i32
  }
  func.func @transform_7(%arg0: i32) -> (i32, i32) {
    %c0_i32 = arith.constant 0 : i32
    %c0_i32_0 = arith.constant 0 : i32
    return %arg0, %c0_i32 : i32, i32
  }
}

</mosaic_0001>

<bundles_post_ra>
// kernel: tpu_custom_call.1
= control target key start
LH: loop header
LB: loop body
LE: loop exit
PB: predicated region body
PF: predicated region fallthrough
CT: control target
= control target key end

     0   :  { %v337_v0 = vmov 0.0|0.0   ;;  %vm338_vm0 = vmmov 0   ;;  %v339_v4 = vmov 0.0   ;;  %vm45_vm1 = vcmask 1043456   ;;  %s449_s1 = inlined_call_operand.vmem [shape: f32[36,96], index: 1, kind: input, shape index: {}]   ;;  %s450_s3 = inlined_call_operand.vmem [shape: f32[96,32], index: 3, kind: input, shape index: {}]   ;;  %s451_s0 = inlined_call_operand.vmem [shape: f32[8,36], index: 0, kind: input, shape index: {}]   ;;  %s452_s2 = inlined_call_operand.vmem [shape: f32[1,96], index: 2, kind: input, shape index: {}]   ;;  %s453_s6 = inlined_call_operand.<no memory space> [shape: f32[1,1], index: 6, kind: input, shape index: {}]   ;;  %s454_s4 = inlined_call_operand.vmem [shape: f32[1,32], index: 4, kind: input, shape index: {}]   ;;  %s455_s5 = inlined_call_operand.vmem [shape: f32[1,32], index: 5, kind: input, shape index: {}]   ;;  %s456_s7 = inlined_call_operand.vmem [shape: f32[8,1], index: 7, kind: output, shape index: {}]  }
   0x1   :  { %306 = vmatprep.subr.bf16.mxu0 %v337_v0  ;;  %v29_v1 = vld [vmem:[%s449_s1] sm:$0xff]  ;;  %v30_v2 = vld [vmem:[%s449_s1 + $0x8] sm:$0xff]  ;;  %v31_v3 = vld [vmem:[%s449_s1 + $0x10] sm:$0xff]  ;;  %276 = vmatprep.mubr.msk.f32.mxu0 %vm338_vm0, %v339_v4  ;;  %vm41_vm2 = vcmask 293888   ;;  %vm139_vm3 = vcmask 785408   ;;  %v12_v33 = vstv %s453_s6  ;;  %vm222_vm4 = vcmask 261120  }
   0x2   :  { %v307_v5 = vpack.c.bf16 %v30_v2, %v29_v1  ;;  %v32_v6 = vld [vmem:[%s449_s1 + $0x18] sm:$0xff]  ;;  %312 = vmatprep.subr.bf16.mxu1 %v337_v0  ;;  %303 = vmatprep.mubr.msk.f32.mxu1 %vm338_vm0, %v339_v4  ;;  %v120_v7 = vld [vmem:[%s450_s3] sm:$0xff]  ;;  %v121_v8 = vld [vmem:[%s450_s3 + $0x8] sm:$0xff]  ;;  %13 = vst [vmem:[#allocation2] sm:$0x1] %v12_v33  ;;  %vm234_vm5 = vcmask 7168  }
   0x3   :  { %v122_v9 = vld [vmem:[%s450_s3 + $0x10] sm:$0xff]  ;;  %v310_v10 = vpack.c.bf16 %v32_v6, %v31_v3  ;;  %v313_v11 = vpack.c.bf16 %v121_v8, %v120_v7  ;;  %v123_v12 = vld [vmem:[%s450_s3 + $0x18] sm:$0xff]  ;;  %v124_v14 = vld [vmem:[%s450_s3 + $0x20] sm:$0xff] }
   0x4   :  { %308 = vmatpush3.bf16.msra.mxu0 %v307_v5  ;;  %v316_v13 = vpack.c.bf16 %v123_v12, %v122_v9  ;;  %v125_v15 = vld [vmem:[%s450_s3 + $0x28] sm:$0xff]  ;;  %v33_v16 = vld [vmem:[%s449_s1 + $0x20] sm:$0xf]  ;;  %v126_v19 = vld [vmem:[%s450_s3 + $0x30] sm:$0xff] }
   0x5   :  { %309 = vmatprep.subr.bf16.mxu0 %v337_v0  ;;  %314 = vmatpush3.bf16.msra.mxu1 %v313_v11  ;;  %v28_v17 = vld [vmem:[%s451_s0] sm:$0xff]  ;;  %v319_v18 = vpack.c.bf16 %v125_v15, %v124_v14  ;;  %v127_v20 = vld [vmem:[%s450_s3 + $0x38] sm:$0xff]  ;;  %v129_v23 = vld [vmem:[%s450_s3 + $0x48] sm:$0xff] }
   0x6   :  { %315 = vmatprep.subr.bf16.mxu1 %v337_v0  ;;  %v322_v21 = vpack.c.bf16 %v127_v20, %v126_v19  ;;  %v128_v22 = vld [vmem:[%s450_s3 + $0x40] sm:$0xff]  ;;  %v130_v25 = vld [vmem:[%s450_s3 + $0x50] sm:$0xff]  ;;  %v131_v26 = vld [vmem:[%s450_s3 + $0x58] sm:$0xff] }
   0x7   :  { %v325_v24 = vpack.c.bf16 %v129_v23, %v128_v22  ;;  %v328_v27 = vpack.c.bf16 %v131_v26, %v130_v25  ;;  %v240_v28 = vld [vmem:[%s452_s2] ss:$0 sm:$0xff] }
   0x8   :  { %311 = vmatpush3.bf16.msra.mxu0 %v310_v10  ;;  %v243_v34 = vld [vmem:[%s454_s4] ss:$0 sm:$0xff] }
   0x9   :  { %274 = vmatprep.subr.mxu0 %v339_v4  ;;  %317 = vmatpush3.bf16.msra.mxu1 %v316_v13  ;;  %v245_v38 = vld [vmem:[%s455_s5] ss:$0 sm:$0xff] }
   0xa   :  { %318 = vmatprep.subr.bf16.mxu1 %v337_v0  ;;  %v246_v42 = vld [vmem:[#allocation2] ss:$0 sm:$0xff] }
   0xc   :  { %275 = vmatpush3.msk.msra.mxu0 %vm45_vm1, %v33_v16 }
   0xd   :  { %277 = vmatmul.mubr.msk.f32.vlgmr.msra.gmra.mrb[0].mxu0 %vm41_vm2, %v28_v17  ;;  %320 = vmatpush3.bf16.msra.mxu1 %v319_v18 }
   0xe   :  { %321 = vmatprep.subr.bf16.mxu1 %v337_v0 }
  0x11   :  { %323 = vmatpush3.bf16.msra.mxu1 %v322_v21 }
  0x12   :  { %324 = vmatprep.subr.bf16.mxu1 %v337_v0 }
  0x15   :  { %326 = vmatpush3.bf16.msra.mxu1 %v325_v24 }
  0x16   :  { %327 = vmatprep.subr.bf16.mxu1 %v337_v0 }
  0x19   :  { %329 = vmatpush3.bf16.msra.mxu1 %v328_v27 }
  0xe0   :  { %v115_v29 = vpop.f32.mrb[0].mxu0 }
  0xe1   :  { %v116_v30 = vadd.f32 %v240_v28, %v115_v29  ;;  %v278_v31 = vpop.f32.mrb[1].mxu0 }
  0xe3   :  { %333 = vtanh.f32 %v116_v30 }
  0xed   :  { %v334_v32 = vpop.eup %333 }
  0xee   :  { %304 = vmatmul.mubr.msk.f32.vlgmr.msra.gmra.mrb[0].mxu1 %vm139_vm3, %v334_v32 }
 0x1c1   :  { %v209_v35 = vpop.f32.mrb[0].mxu1 }
 0x1c2   :  { %v210_v36 = vadd.f32 %v243_v34, %v209_v35  ;;  %v305_v37 = vpop.f32.mrb[1].mxu1 }
 0x1c4   :  { %335 = vtanh.f32 %v210_v36 }
 0x1ce   :  { %v336_v39 = vpop.eup %335 }
 0x1cf   :  { %v221_v40 = vmul.f32 %v336_v39, %v245_v38 }
 0x1d1   :  { %v223_v41 = vsel %vm222_vm4, %v221_v40, 0.0 }
 0x1d2   :  { %224 = vadd.xlane.f32.xlu0 %v223_v41 }
 0x25f   :  { %v225_v43 = vpop.xlane.xlu0 %224 }
 0x260   :  { %v233_v44 = vadd.f32 %v246_v42, %v225_v43 }
 0x262   :  { %235 = vst.msk [vmem:[%s456_s7] sm:$0xff] %vm234_vm5, %v233_v44 }

</bundles_post_ra>
